<compile_context>
chip_gen: v5e
topology: v5e:2x2
jax: 0.10.0
libtpu: 0.0.40
codegen_flags: <defaults>
</compile_context>

<pallas_src>
import functools

import jax
import jax.numpy as jnp
from jax.experimental import pallas as pl
from jax.experimental.pallas import tpu as pltpu


# ---------------------------------------------------------------------------
# Hardware query
# ---------------------------------------------------------------------------
def _vmem_capacity_bytes():
    """Physical VMEM per TensorCore; conservative default if query fails."""
    try:
        return int(pltpu.get_tpu_info().vmem_capacity_bytes)
    except Exception:
        return 64 << 20  # v7x per-TC (smallest current generation)


# ---------------------------------------------------------------------------
# Kernels
# ---------------------------------------------------------------------------
def _se_fused_kernel(x_ref, w1_ref, w2_ref, o_ref, *, inv_s):
    """Single-read fused SE: mean -> excitation -> gate -> multiply.

    x_ref : (1, C, S)   input slab (input dtype), S on the lane axis
    w1_ref: (1, C, inc) fp32, w1[0,c,i] = reduce_conv.weight[i,c]
    w2_ref: (1, C, inc) fp32, w2[0,c,i] = expand_conv.weight[c,i]
    o_ref : (1, C, S)   output slab (input dtype)
    """
    # fp32 spatial mean (widening fused into the reduction; padding is zero).
    mean = jnp.sum(x_ref[...], axis=-1, keepdims=True,
                   dtype=jnp.float32) * inv_s                     # (1, C, 1)
    # Reduce conv + ReLU: z[i] = relu(sum_c w_reduce[i,c] * mean[c])
    z = jnp.maximum(
        jnp.sum(w1_ref[...] * mean, axis=1, keepdims=True), 0.0)  # (1, 1, inc)
    # Expand conv: a[c] = sum_i w_expand[c,i] * z[i]
    a = jnp.sum(w2_ref[...] * z, axis=2, keepdims=True)           # (1, C, 1)
    gate = jax.nn.sigmoid(a).astype(o_ref.dtype)                  # one tiny cast per n
    # Lane-dense gated store (streams straight from VMEM to VMEM).
    o_ref[...] = x_ref[...] * gate


def _sum_kernel(x_ref, sum_ref):
    """Fallback pass 1: per-(n,c) spatial sum, fp32 accumulation over S tiles."""
    @pl.when(pl.program_id(1) == 0)
    def _():
        sum_ref[...] = jnp.zeros_like(sum_ref)

    sum_ref[...] += jnp.sum(x_ref[...], axis=-1, keepdims=True,
                            dtype=jnp.float32)


def _apply_kernel(gate_ref, x_ref, o_ref):
    """Fallback pass 2: lane-dense streaming gate apply (gate pre-cast)."""
    o_ref[...] = x_ref[...] * gate_ref[...]


# ---------------------------------------------------------------------------
# Wrapper
# ---------------------------------------------------------------------------
def _choose_s_tile(S, C, itemsize, target_bytes=4 << 20):
    """Pick a lane-dense S tile (~4 MiB per block buffer) dividing S (S%128==0)."""
    row_bytes = max(1, C * itemsize)
    tile = max(128, (target_bytes // row_bytes) // 128 * 128)
    tile = min(tile, S)
    while S % tile != 0:   # stays a multiple of 128, terminates at 128
        tile -= 128
    return int(tile)


def se_forward(inputs, w_reduce, w_expand, *, force_two_pass=False):
    """SE block forward.

    inputs   : (N, C, D, H, W)  -- PyTorch NCDHW convention
    w_reduce : (inc, C)         -- Conv3d(C, inc, 1, bias=False).weight squeezed
    w_expand : (C, inc)         -- Conv3d(inc, C, 1, bias=False).weight squeezed
    returns  : (N, C, D, H, W)
    """
    N, C, D, H, W = inputs.shape
    S = D * H * W
    dtype = inputs.dtype
    itemsize = jnp.dtype(dtype).itemsize
    inc = w_reduce.shape[0]

    # Free reshape: NCDHW is contiguous over D,H,W -> (N, C, S), S on lanes.
    x = inputs.reshape(N, C, S)

    physical_vmem = _vmem_capacity_bytes()
    slab_bytes = C * S * itemsize
    # Fused path double-buffers the input slab AND the output slab: ~4x slab.
    fused_fits = (4 * slab_bytes + (4 << 20)) <= (physical_vmem * 3) // 4

    if fused_fits and not force_two_pass:
        # Weights laid out with C on the sublane axis (no in-kernel transposes).
        w1 = w_reduce.astype(jnp.float32).T.reshape(1, C, inc)   # (1, C, inc)
        w2 = w_expand.astype(jnp.float32).reshape(1, C, inc)     # (1, C, inc)
        vmem_limit = int(min((physical_vmem * 7) // 8,
                             max(4 * slab_bytes + (8 << 20), 32 << 20)))
        out = pl.pallas_call(
            functools.partial(_se_fused_kernel, inv_s=1.0 / float(S)),
            out_shape=jax.ShapeDtypeStruct((N, C, S), dtype),
            grid_spec=pltpu.PrefetchScalarGridSpec(
                num_scalar_prefetch=0,
                grid=(N,),
                in_specs=[
                    pl.BlockSpec((1, C, S), lambda n: (n, 0, 0)),     # x slab
                    pl.BlockSpec((1, C, inc), lambda n: (0, 0, 0)),   # w1 (resident)
                    pl.BlockSpec((1, C, inc), lambda n: (0, 0, 0)),   # w2 (resident)
                ],
                out_specs=pl.BlockSpec((1, C, S), lambda n: (n, 0, 0)),
            ),
            compiler_params=pltpu.CompilerParams(
                dimension_semantics=("parallel",),
                vmem_limit_bytes=vmem_limit),
        )(x, w1, w2)
        return out.reshape(N, C, D, H, W)

    # ----------------- two-pass fallback (large C*S) -----------------------
    # Zero-pad ragged S to a multiple of 128 (sum-neutral; pad sliced off),
    # preserving the tiled, double-buffered, lane-dense path.
    S_pad = ((S + 127) // 128) * 128
    if S_pad != S:
        x = jnp.pad(x, ((0, 0), (0, 0), (0, S_pad - S)))

    s_tile = _choose_s_tile(S_pad, C, itemsize)
    n_s = S_pad // s_tile
    tile_bytes = C * s_tile * itemsize

    # --- Pass 1: per-(n, c) spatial sum, fp32 accumulation across S tiles ---
    p1_limit = int(min((physical_vmem * 7) // 8,
                       max(2 * tile_bytes + (8 << 20), 32 << 20)))
    sums = pl.pallas_call(
        _sum_kernel,
        out_shape=jax.ShapeDtypeStruct((N, C, 1), jnp.float32),
        grid_spec=pltpu.PrefetchScalarGridSpec(
            num_scalar_prefetch=0,
            grid=(N, n_s),
            in_specs=[pl.BlockSpec((1, C, s_tile), lambda n, s: (n, 0, s))],
            out_specs=pl.BlockSpec((1, C, 1), lambda n, s: (n, 0, 0)),
        ),
        compiler_params=pltpu.CompilerParams(
            dimension_semantics=("parallel", "arbitrary"),
            vmem_limit_bytes=p1_limit),
    )(x)

    # Tiny excitation math (O(N*C*inc)), negligible vs the streaming passes.
    mean = sums[:, :, 0] / jnp.float32(S)                           # (N, C)
    z = jnp.maximum(mean @ w_reduce.astype(jnp.float32).T, 0.0)     # (N, inc)
    a = z @ w_expand.astype(jnp.float32).T                          # (N, C)
    gate = jax.nn.sigmoid(a)[:, :, None].astype(dtype)              # pre-cast once

    # --- Pass 2: streaming, lane-dense gate apply ---
    p2_limit = int(min((physical_vmem * 7) // 8,
                       max(4 * tile_bytes + (8 << 20), 32 << 20)))
    out = pl.pallas_call(
        _apply_kernel,
        out_shape=jax.ShapeDtypeStruct((N, C, S_pad), dtype),
        grid_spec=pltpu.PrefetchScalarGridSpec(
            num_scalar_prefetch=0,
            grid=(N, n_s),
            in_specs=[
                pl.BlockSpec((1, C, 1), lambda n, s: (n, 0, 0)),       # gate
                pl.BlockSpec((1, C, s_tile), lambda n, s: (n, 0, s)),  # x
            ],
            out_specs=pl.BlockSpec((1, C, s_tile), lambda n, s: (n, 0, s)),
        ),
        compiler_params=pltpu.CompilerParams(
            dimension_semantics=("parallel", "parallel"),
            vmem_limit_bytes=p2_limit),
    )(gate, x)

    if S_pad != S:
        out = out[:, :, :S]
    return out.reshape(N, C, D, H, W)


def se_reference(inputs, w_reduce, w_expand):
    """Pure-JAX reference matching the PyTorch module semantics."""
    x = jnp.mean(inputs, axis=(2, 3, 4), keepdims=True)             # (N,C,1,1,1)
    x = jnp.einsum('ncdhw,oc->nodhw', x, w_reduce)                   # reduce conv
    x = jnp.maximum(x, 0.0)
    x = jnp.einsum('nidhw,oi->nodhw', x, w_expand)                   # expand conv
    return jax.nn.sigmoid(x) * inputs


if __name__ == "__main__":
    key = jax.random.PRNGKey(0)
    k_x, k_w1, k_w2, k_x2 = jax.random.split(key, 4)

    # Small shapes consistent with the module: channels=32, reduction=16 -> inc=2
    N, C, D, H, W = 2, 32, 4, 8, 8
    reduction = 16
    inc = max(1, C // reduction)

    x = jax.random.normal(k_x, (N, C, D, H, W), dtype=jnp.float32)
    # Deterministic synthetic weights (Conv3d kernels with 1x1x1 spatial, no bias).
    w_reduce = jax.random.normal(k_w1, (inc, C), dtype=jnp.float32) * (1.0 / C) ** 0.5
    w_expand = jax.random.normal(k_w2, (C, inc), dtype=jnp.float32) * (1.0 / inc) ** 0.5

    # --- fused (primary) path ---
    out = se_forward(x, w_reduce, w_expand)
    out = jax.block_until_ready(out)
    ref = se_reference(x, w_reduce, w_expand)
    assert out.shape == x.shape and out.dtype == x.dtype
    assert jnp.allclose(out, ref, atol=1e-5, rtol=1e-5), "fused path mismatch"

    # --- two-pass fallback path (ragged S exercises the padding logic) ---
    Dr, Hr, Wr = 3, 5, 7
    x2 = jax.random.normal(k_x2, (N, C, Dr, Hr, Wr), dtype=jnp.float32)
    out2 = se_forward(x2, w_reduce, w_expand, force_two_pass=True)
    out2 = jax.block_until_ready(out2)
    ref2 = se_reference(x2, w_reduce, w_expand)
    assert out2.shape == x2.shape and out2.dtype == x2.dtype
    assert jnp.allclose(out2, ref2, atol=1e-5, rtol=1e-5), "two-pass path mismatch"

    print("KERNEL_OK")
</pallas_src>

<mosaic_0001>
module attributes {stable_mosaic.version = 11 : i64} {
  func.func @_se_fused_kernel(%arg0: i32, %arg1: memref<1x32x256xf32, #tpu.memory_space<vmem>>, %arg2: memref<1x32x2xf32, #tpu.memory_space<vmem>>, %arg3: memref<1x32x2xf32, #tpu.memory_space<vmem>>, %arg4: memref<1x32x256xf32, #tpu.memory_space<vmem>>) attributes {dimension_semantics = [#tpu.dimension_semantics<parallel>], iteration_bounds = array<i64: 2>, scalar_prefetch = 0 : i64, scratch_operands = 0 : i64, tpu.core_type = #tpu.core_type<tc>, window_params = [{transform_indices = @transform_0, window_bounds = array<i64: 1, 32, 256>}, {pipeline_mode = #tpu.pipeline_mode<synchronous>, transform_indices = @transform_1, window_bounds = array<i64: 1, 32, 2>}, {pipeline_mode = #tpu.pipeline_mode<synchronous>, transform_indices = @transform_2, window_bounds = array<i64: 1, 32, 2>}, {transform_indices = @transform_3, window_bounds = array<i64: 1, 32, 256>}]} {
    %c0 = arith.constant 0 : index
    %c0_0 = arith.constant 0 : index
    %c0_1 = arith.constant 0 : index
    %0 = vector.load %arg1[%c0, %c0_0, %c0_1] : memref<1x32x256xf32, #tpu.memory_space<vmem>>, vector<1x32x256xf32>
    %cst = arith.constant dense<0.000000e+00> : vector<1x32xf32>
    %1 = vector.multi_reduction <add>, %0, %cst [2] : vector<1x32x256xf32> to vector<1x32xf32>
    %2 = vector.shape_cast %1 : vector<1x32xf32> to vector<1x32x1xf32>
    %cst_2 = arith.constant 3.906250e-03 : f32
    %3 = vector.broadcast %cst_2 : f32 to vector<1x32x1xf32>
    %4 = arith.mulf %2, %3 : vector<1x32x1xf32>
    %c0_3 = arith.constant 0 : index
    %c0_4 = arith.constant 0 : index
    %c0_5 = arith.constant 0 : index
    %5 = vector.load %arg2[%c0_3, %c0_4, %c0_5] : memref<1x32x2xf32, #tpu.memory_space<vmem>>, vector<1x32x2xf32>
    %6 = vector.broadcast %4 : vector<1x32x1xf32> to vector<1x32x2xf32>
    %7 = arith.mulf %5, %6 : vector<1x32x2xf32>
    %cst_6 = arith.constant dense<0.000000e+00> : vector<1x2xf32>
    %8 = vector.multi_reduction <add>, %7, %cst_6 [1] : vector<1x32x2xf32> to vector<1x2xf32>
    %9 = vector.shape_cast %8 : vector<1x2xf32> to vector<1x1x2xf32>
    %cst_7 = arith.constant 0.000000e+00 : f32
    %10 = vector.broadcast %cst_7 : f32 to vector<1x1x2xf32>
    %11 = arith.maximumf %9, %10 : vector<1x1x2xf32>
    %c0_8 = arith.constant 0 : index
    %c0_9 = arith.constant 0 : index
    %c0_10 = arith.constant 0 : index
    %12 = vector.load %arg3[%c0_8, %c0_9, %c0_10] : memref<1x32x2xf32, #tpu.memory_space<vmem>>, vector<1x32x2xf32>
    %13 = vector.broadcast %11 : vector<1x1x2xf32> to vector<1x32x2xf32>
    %14 = arith.mulf %12, %13 : vector<1x32x2xf32>
    %cst_11 = arith.constant dense<0.000000e+00> : vector<1x32xf32>
    %15 = vector.multi_reduction <add>, %14, %cst_11 [2] : vector<1x32x2xf32> to vector<1x32xf32>
    %16 = vector.shape_cast %15 : vector<1x32xf32> to vector<1x32x1xf32>
    %17 = arith.negf %16 : vector<1x32x1xf32>
    %18 = math.exp %17 : vector<1x32x1xf32>
    %cst_12 = arith.constant 1.000000e+00 : f32
    %19 = vector.broadcast %cst_12 : f32 to vector<1x32x1xf32>
    %20 = arith.addf %19, %18 : vector<1x32x1xf32>
    %21 = arith.divf %19, %20 : vector<1x32x1xf32>
    %c0_13 = arith.constant 0 : index
    %c0_14 = arith.constant 0 : index
    %c0_15 = arith.constant 0 : index
    %22 = vector.load %arg1[%c0_13, %c0_14, %c0_15] : memref<1x32x256xf32, #tpu.memory_space<vmem>>, vector<1x32x256xf32>
    %23 = vector.broadcast %21 : vector<1x32x1xf32> to vector<1x32x256xf32>
    %24 = arith.mulf %22, %23 : vector<1x32x256xf32>
    %c0_16 = arith.constant 0 : index
    %c0_17 = arith.constant 0 : index
    %c0_18 = arith.constant 0 : index
    %25 = vector.load %arg4[%c0_16, %c0_17, %c0_18] : memref<1x32x256xf32, #tpu.memory_space<vmem>>, vector<1x32x256xf32>
    tpu.vector_store %arg4[%c0_16, %c0_17, %c0_18], %24 {strides = array<i32>} : memref<1x32x256xf32, #tpu.memory_space<vmem>>, vector<1x32x256xf32>,
    return
  }
  func.func @transform_0(%arg0: i32) -> (i32, i32, i32) {
    %c0_i32 = arith.constant 0 : i32
    %c0_i32_0 = arith.constant 0 : i32
    %c0_i32_1 = arith.constant 0 : i32
    return %arg0, %c0_i32, %c0_i32_0 : i32, i32, i32
  }
  func.func @transform_1(%arg0: i32) -> (i32, i32, i32) {
    %c0_i32 = arith.constant 0 : i32
    %c0_i32_0 = arith.constant 0 : i32
    %c0_i32_1 = arith.constant 0 : i32
    %c0_i32_2 = arith.constant 0 : i32
    return %c0_i32, %c0_i32_0, %c0_i32_1 : i32, i32, i32
  }
  func.func @transform_2(%arg0: i32) -> (i32, i32, i32) {
    %c0_i32 = arith.constant 0 : i32
    %c0_i32_0 = arith.constant 0 : i32
    %c0_i32_1 = arith.constant 0 : i32
    %c0_i32_2 = arith.constant 0 : i32
    return %c0_i32, %c0_i32_0, %c0_i32_1 : i32, i32, i32
  }
  func.func @transform_3(%arg0: i32) -> (i32, i32, i32) {
    %c0_i32 = arith.constant 0 : i32
    %c0_i32_0 = arith.constant 0 : i32
    %c0_i32_1 = arith.constant 0 : i32
    return %arg0, %c0_i32, %c0_i32_0 : i32, i32, i32
  }
}

</mosaic_0001>

<bundles_post_ra>
// kernel: tpu_custom_call.1
= control target key start
LH: loop header
LB: loop body
LE: loop exit
PB: predicated region body
PF: predicated region fallthrough
CT: control target
= control target key end

     0   :  { %8 = vsyncpa [#allocation3], 0  ;;  %s860_s0 = inlined_call_operand.hbm [shape: f32[2,32,256], index: 0, kind: input, shape index: {}]   ;;  %s861_s1 = inlined_call_operand.vmem [shape: f32[1,32,2], index: 1, kind: input, shape index: {}]   ;;  %s862_s2 = inlined_call_operand.vmem [shape: f32[1,32,2], index: 2, kind: input, shape index: {}]   ;;  %s863_s3 = inlined_call_operand.hbm [shape: f32[2,32,256], index: 3, kind: output, shape index: {}]  }
   0x1   :  { %10 = vsyncpa [#allocation3 + $0x1], 0 }
   0x2   :  { %11 = vsyncpa [#allocation4], 0 }
   0x3   :  { %13 = vsyncpa [#allocation4 + $0x1], 0  ;;  %s647_s12 = smov 0   ;;  %s649_s13 = smov 0  }
   0x4   :  { %s651_s14 = smov 0   ;;  %s653_s15 = smov 0  }
   0x5 LB: > { %s668_s16 = sadd.s32 4294967295, %s621_s15   ;;  %s439_s17 = sadd.s32 4294967294, %s621_s15   ;;  %s621_s15 = sphi %s653_s15, %s873_s15   ;;  %s617_s14 = sphi %s651_s14, %s872_s14   ;;  %s613_s13 = sphi %s649_s13, %s871_s13   ;;  %s609_s12 = sphi %s647_s12, %s870_s12  }
   0x6   : > { %s672_s18 = sadd.s32 1, %s621_s15   ;;  %s26_s19 = sadd.s32 1, %s617_s14 }
   0x7   : > { %s23_s20 = ssub.s32 %s621_s15, %s672_s18  ;;  %p33_p0 = scmp.ne.s32.totalorder %s617_s14, %s613_s13 }
   0x8   : > { %p24_p1 = scmp.eq.s32.totalorder %s23_s20, 0  ;;  %p34_p2 = scmp.eq.s32.totalorder %s621_s15, 0 }
   0x9   : > { %p39_p3 = scmp.ne.s32.totalorder %s613_s13, %s609_s12  ;;  %p40_p4 = scmp.eq.s32.totalorder %s668_s16, 0 }
   0xa   : > { %s684_s21 = scalar_select %p24_p1, %s617_s14, %s26_s19  }
   0xb   : > { %p686_p5 = por %p34_p2, %p33_p0  ;;  %p690_p6 = por %p40_p4, %p39_p3 }
   0xc   : > { %p105_p7 = scmp.eq.s32.totalorder %s668_s16, 1  ;;  %p111_p8 = scmp.eq.s32.totalorder %s439_s17, 1 }
   0xd   : > { %p471_p10 = scmp.lt.s32.totalorder %s621_s15, 2  ;;  %s137_s26 = sand.u32 1, %s617_s14  }
   0xe   : > { %p697_p11 = por %p105_p7, %p33_p0  ;;  %p701_p12 = por %p111_p8, %p39_p3 }
   0xf   : > { %s457_s27 = sshll.u32 %s621_s15, 6  ;;  %s442_s28 = sshll.u32 %s137_s26, 6 }
  0x10   : > { %s146_s4 = scalar_lea.hbm %s860_s0, %s457_s27  ;;  %s141_s6 = scalar_lea.vmem [#allocation2], %s442_s28 }
  0x11   : > { %s147_s5 = sshll.u32 %s146_s4, 4  ;;  %s149_s7 = sshll.u32 %s141_s6, 4  ;;  %s148_s5 = int_to_ptr.hbm [resolvable:$true] %s147_s5  ;;  %s150_s7 = int_to_ptr.vmem [resolvable:$true] %s149_s7 }
  0x12   : > { %p712_p13 = pnand %p471_p10, %p686_p5  ;;  %p445_p0 = scmp.ge.s32.totalorder %s621_s15, 1 }
  0x13   : > { %p157_p1 = scmp.lt.s32.totalorder %s621_s15, 3  ;;  %s138_s9 = scalar_lea.sflag [#allocation3], %s137_s26 }
  0x14   : > { %s525_s10 = sshra.s32 %s148_s5, 4  ;;  %p529_p3 = pneg %p712_p13  ;;  %s526_s10 = int_to_ptr.hbm [resolvable:$true] %s525_s10 }
  0x15   : > { %s527_s11 = scalar_lea.hbm %s526_s10, 64  ;;  %s532_s20 = scalar_lea.hbm %s860_s0, 128 }
  0x16   : > { %p528_p2 = scmp.ne.s32.totalorder %s526_s10, %s527_s11  ;;  %p533_p5 = scmp.lt.s32.totalorder %s526_s10, %s860_s0 }
  0x17   : > { %p534_p8 = scmp.lt.s32.totalorder %s532_s20, %s527_s11 }
  0x18   : > { %p530_p4 = pnand %p529_p3, %p528_p2 }
  0x19   : > { %p535_p10 = por %p534_p8, %p533_p5 }
  0x1a   : > { %p531_p7 = pneg %p530_p4 }
  0x1c   : > { %p536_p9 = pnand %p535_p10, %p531_p7 }
  0x1e   : > { %539 = shalt.err (!%p536_p9)
}
  0x1f   : > { %s623_s26 = smov 256   ;;  %s624_s28 = smov 16  }
  0x20   : > { %466 = dma.hbm_to_vmem [thread:$0]  (!%p712_p13), %s148_s5, 1024, %s150_s7, %s138_s9, %s623_s26, %s623_s26, %s624_s28  }
  0x21   : > { %p158_p2 = pnand %p445_p0, %p157_p1 }
  0x22   : > { %s733_s29 = sand.u32 (!%p158_p2), 1, %s613_s13  }
  0x23   : > { %161 = sbr.rel (%p158_p2) target bundleno = 358 (0x166), region = 32  ;;  %s446_s30 = sshll.u32 (!%p158_p2), %s733_s29, 6 }
  0x24   : > { %s164_s4 = scalar_lea.sflag (!%p158_p2), [#allocation3], %s733_s29  ;;  %s167_s6 = scalar_lea.vmem (!%p158_p2), [#allocation2], %s446_s30 }
  0x28   : > { %600 = dma.done.wait (%p690_p6), %s164_s4, 1024  }
  0x29   : > { %602 = vsyncadd (%p690_p6), %s164_s4, 4294966272  ;;  %v743_v0 = vld [vmem:[%s167_s6] sm:$0xff]  ;;  %v745_v1 = vld [vmem:[%s167_s6 + $0x8] sm:$0xff]  ;;  %vm223_vm0 = vcmask 15360   ;;  %s809_s23 = scalar_lea.vmem [#allocation5], %s446_s30  ;;  %s458_s5 = sshll.u32 %s668_s16, 6 }
  0x2a   : > { %v747_v2 = vld [vmem:[%s167_s6 + $0x20] sm:$0xff]  ;;  %v199_v3 = vadd.f32 %v745_v1, %v743_v0  ;;  %v751_v4 = vld [vmem:[%s167_s6 + $0x28] sm:$0xff]  ;;  %v755_v6 = vld [vmem:[%s167_s6 + $0x10] sm:$0xff]  ;;  %s362_s16 = scalar_lea.hbm %s863_s3, %s458_s5  ;;  %s363_s8 = sshll.u32 %s809_s23, 4  ;;  %s364_s8 = int_to_ptr.vmem [resolvable:$true] %s363_s8 }
  0x2b   : > { %v205_v5 = vadd.f32 %v751_v4, %v747_v2  ;;  %v757_v7 = vld [vmem:[%s167_s6 + $0x18] sm:$0xff]  ;;  %v759_v8 = vld [vmem:[%s167_s6 + $0x30] sm:$0xff]  ;;  %v215_v15 = vld [vmem:[%s861_s1] sm:$0xff]  ;;  %s365_s9 = sshll.u32 %s362_s16, 4  ;;  %s351_s10 = scalar_lea.sflag [#allocation4], %s733_s29  ;;  %s366_s9 = int_to_ptr.hbm [resolvable:$true] %s365_s9 }
  0x2c   : > { %200 = vadd.xlane.f32.xlu0 %v199_v3  ;;  %v761_v9 = vld [vmem:[%s167_s6 + $0x38] sm:$0xff]  ;;  %v202_v10 = vadd.f32 %v757_v7, %v755_v6  ;;  %v217_v17 = vld [vmem:[%s861_s1 + $0x10] sm:$0xff]  ;;  %v216_v18 = vld [vmem:[%s861_s1 + $0x8] sm:$0xff]  ;;  %s569_s11 = sshra.s32 %s366_s9, 4  ;;  %s575_s22 = scalar_lea.hbm %s863_s3, 128  ;;  %s570_s11 = int_to_ptr.hbm [resolvable:$true] %s569_s11 }
  0x2d   : > { %206 = vadd.xlane.f32.xlu1 %v205_v5  ;;  %v208_v11 = vadd.f32 %v761_v9, %v759_v8  ;;  %v218_v22 = vld [vmem:[%s861_s1 + $0x18] sm:$0xff]  ;;  %v240_v42 = vld [vmem:[%s862_s2 + $0x10] sm:$0xff]  ;;  %v238_v43 = vld [vmem:[%s862_s2] sm:$0xff]  ;;  %s571_s17 = scalar_lea.hbm %s570_s11, 64  ;;  %p576_p0 = scmp.lt.s32.totalorder %s570_s11, %s863_s3 }
  0x2e   : > { %v241_v41 = vld [vmem:[%s862_s2 + $0x18] sm:$0xff]  ;;  %v239_v51 = vld [vmem:[%s862_s2 + $0x8] sm:$0xff]  ;;  %p572_p6 = scmp.ne.s32.totalorder %s570_s11, %s571_s17  ;;  %p577_p1 = scmp.lt.s32.totalorder %s575_s22, %s571_s17 }
  0x30   : > { %p573_p9 = pnand %p572_p6, %p697_p11  ;;  %p578_p3 = por %p577_p1, %p576_p0 }
  0x32   : > { %p574_p13 = pneg %p573_p9 }
  0x34   : > { %203 = vadd.xlane.f32.xlu0 %v202_v10  ;;  %p579_p4 = pnand %p578_p3, %p574_p13 }
  0x35   : > { %209 = vadd.xlane.f32.xlu1 %v208_v11 }
  0x9f   : > { %v201_v12 = vpop.xlane.xlu0 %200 }
  0xa0   : > { %v207_v13 = vpop.xlane.xlu1 %206  ;;  %v211_v14 = vmul.f32 0.00390625, %v201_v12 }
  0xa1   : > { %v213_v16 = vmul.f32 0.00390625, %v207_v13 }
  0xa2   : > { %v219_v20 = vmul.f32 %v215_v15, %v211_v14 }
  0xa3   : > { %v221_v25 = vmul.f32 %v217_v17, %v213_v16 }
  0xa4   : > { %v224_v28 = vsel %vm223_vm0, %v219_v20, 0.0 }
  0xa5   : > { %v227_v31 = vsel %vm223_vm0, %v221_v25, 0.0 }
  0xa7   : > { %v204_v19 = vpop.xlane.xlu0 %203 }
  0xa8   : > { %v212_v21 = vmul.f32 0.00390625, %v204_v19  ;;  %v210_v23 = vpop.xlane.xlu1 %209 }
  0xa9   : > { %v214_v24 = vmul.f32 0.00390625, %v210_v23 }
  0xaa   : > { %v220_v26 = vmul.f32 %v216_v18, %v212_v21 }
  0xab   : > { %v222_v27 = vmul.f32 %v218_v22, %v214_v24 }
  0xac   : > { %v225_v29 = vsel %vm223_vm0, %v220_v26, 0.0 }
  0xad   : > { %v226_v30 = vadd.f32 %v225_v29, %v224_v28  ;;  %v229_v32 = vsel %vm223_vm0, %v222_v27, 0.0 }
  0xaf   : > { %v228_v33 = vadd.f32 %v227_v31, %v226_v30 }
  0xb1   : > { %v230_v34 = vadd.f32 %v229_v32, %v228_v33 }
  0xb3   : > { %v231_v35 = vrot.slane %v230_v34, 4 }
  0xb5   : > { %v232_v36 = vadd.f32 %v231_v35, %v230_v34 }
  0xb7   : > { %v233_v37 = vrot.slane %v232_v36, 2 }
  0xb9   : > { %v234_v38 = vadd.f32 %v233_v37, %v232_v36 }
  0xbb   : > { %v235_v39 = vrot.slane %v234_v38, 1 }
  0xbd   : > { %v236_v40 = vadd.f32 %v235_v39, %v234_v38 }
  0xbf   : > { %v237_v44 = vmax.f32 %v236_v40, 0.0 }
  0xc1   : > { %v245_v45 = vmul.f32 %v241_v41, %v237_v44  ;;  %v244_v46 = vmul.f32 %v240_v42, %v237_v44  ;;  %v242_v47 = vmul.f32 %v238_v43, %v237_v44  ;;  %v243_v52 = vmul.f32 %v239_v51, %v237_v44 }
  0xc3   : > { %v255_v48 = vsel %vm223_vm0, %v245_v45, 0.0  ;;  %v252_v49 = vsel %vm223_vm0, %v244_v46, 0.0  ;;  %v246_v50 = vsel %vm223_vm0, %v242_v47, 0.0  ;;  %v249_v53 = vsel %vm223_vm0, %v243_v52, 0.0 }
  0xc4   : > { %256 = vadd.xlane.f32.xlu1 %v255_v48  ;;  %253 = vadd.xlane.f32.xlu0 %v252_v49 }
  0xc5   : > { %247 = vadd.xlane.f32.xlu2 %v246_v50 }
  0xcd   : > { %250 = vadd.xlane.f32.xlu2 %v249_v53 }
 0x137   : > { %v257_v54 = vpop.xlane.xlu1 %256  ;;  %v254_v55 = vpop.xlane.xlu0 %253 }
 0x138   : > { %v451_v56 = vmul.f32 -1.442695, %v257_v54  ;;  %v450_v57 = vmul.f32 -1.442695, %v254_v55  ;;  %v248_v58 = vpop.xlane.xlu2 %247 }
 0x139   : > { %v448_v59 = vmul.f32 -1.442695, %v248_v58 }
 0x13a   : > { %509 = vpow2.f32 %v451_v56 }
 0x13b   : > { %511 = vpow2.f32 %v450_v57 }
 0x13c   : > { %513 = vpow2.f32 %v448_v59 }
 0x140   : > { %v510_v60 = vpop.eup %509  ;;  %v251_v61 = vpop.xlane.xlu2 %250 }
 0x141   : > { %v512_v62 = vpop.eup %511  ;;  %v273_v63 = vadd.f32 1.0, %v510_v60  ;;  %v449_v3 = vmul.f32 -1.442695, %v251_v61 }
 0x142   : > { %v514_v5 = vpop.eup %513  ;;  %v272_v10 = vadd.f32 1.0, %v512_v62 }
 0x143   : > { %515 = vrcp.f32 %v273_v63  ;;  %v270_v11 = vadd.f32 1.0, %v514_v5  ;;  %v328_v18 = vand.u32 2147483647, %v273_v63  ;;  %v330_v21 = vand.u32 2147483648, %v273_v63 }
 0x144   : > { %517 = vrcp.f32 %v272_v10  ;;  %v315_v23 = vand.u32 2147483648, %v272_v10  ;;  %vm324_vm2 = vweird.f32 %v273_v63  ;;  %v313_v27 = vand.u32 2147483647, %v272_v10 }
 0x145   : > { %519 = vpow2.f32 %v449_v3  ;;  %vm329_vm4 = vcmp.eq.f32.partialorder %v328_v18, 8.507059e+37  ;;  %vm309_vm5 = vweird.f32 %v272_v10  ;;  %v331_v30 = vor.u32 1.1754944e-38, %v330_v21 }
 0x146   : > { %521 = vrcp.f32 %v270_v11  ;;  %v316_v32 = vor.u32 1.1754944e-38, %v315_v23  ;;  %v285_v33 = vand.u32 2147483648, %v270_v11  ;;  %v283_v36 = vand.u32 2147483647, %v270_v11 }
 0x147   : > { %vm314_vm9 = vcmp.eq.f32.partialorder %v313_v27, 8.507059e+37  ;;  %vm279_vm10 = vweird.f32 %v270_v11 }
 0x148   : > { %v286_v46 = vor.u32 1.1754944e-38, %v285_v33  ;;  %vm284_vm12 = vcmp.eq.f32.partialorder %v283_v36, 8.507059e+37 }
 0x149   : > { %v516_v12 = vpop.eup %515 }
 0x14a   : > { %v518_v13 = vpop.eup %517  ;;  %v320_v14 = vmul.f32 %v516_v12, %v273_v63  ;;  %vm325_vm1 = vweird.f32 %v516_v12 }
 0x14b   : > { %v520_v15 = vpop.eup %519  ;;  %v305_v16 = vmul.f32 %v518_v13, %v272_v10  ;;  %vm310_vm3 = vweird.f32 %v518_v13  ;;  %vm326_vm6 = vmor %vm324_vm2, %vm325_vm1 }
 0x14c   : > { %v321_v17 = vsub.f32 1.0, %v320_v14  ;;  %v799_v19 = vadd.f32 1.0, %v520_v15  ;;  %v522_v20 = vpop.eup %521  ;;  %vm311_vm7 = vmor %vm309_vm5, %vm310_vm3 }
 0x14d   : > { %v306_v22 = vsub.f32 1.0, %v305_v16  ;;  %v275_v25 = vmul.f32 %v522_v20, %v270_v11  ;;  %vm280_vm8 = vweird.f32 %v522_v20 }
 0x14e   : > { %v322_v24 = vmul.f32 %v516_v12, %v321_v17  ;;  %523 = vrcp.f32 %v799_v19  ;;  %vm281_vm11 = vmor %vm279_vm10, %vm280_vm8  ;;  %v300_v49 = vand.u32 2147483648, %v799_v19  ;;  %v298_v51 = vand.u32 2147483647, %v799_v19 }
 0x14f   : > { %v307_v26 = vmul.f32 %v518_v13, %v306_v22  ;;  %v276_v29 = vsub.f32 1.0, %v275_v25  ;;  %vm294_vm14 = vweird.f32 %v799_v19 }
 0x150   : > { %v323_v28 = vadd.f32 %v516_v12, %v322_v24  ;;  %vm299_vm0 = vcmp.eq.f32.partialorder %v298_v51, 8.507059e+37 }
 0x151   : > { %v308_v31 = vadd.f32 %v518_v13, %v307_v26  ;;  %v277_v35 = vmul.f32 %v522_v20, %v276_v29 }
 0x152   : > { %v327_v34 = vsel %vm326_vm6, %v516_v12, %v323_v28 }
 0x153   : > { %v332_v37 = vsel %vm329_vm4, %v331_v30, %v327_v34  ;;  %v312_v38 = vsel %vm311_vm7, %v518_v13, %v308_v31  ;;  %v278_v43 = vadd.f32 %v522_v20, %v277_v35 }
 0x154   : > { %v524_v39 = vpop.eup %523  ;;  %v340_v40 = vmul.f32 %v332_v37, %v759_v8  ;;  %v341_v41 = vmul.f32 %v332_v37, %v761_v9  ;;  %v317_v42 = vsel %vm314_vm9, %v316_v32, %v312_v38 }
 0x155   : > { %v338_v44 = vmul.f32 %v317_v42, %v747_v2  ;;  %v339_v45 = vmul.f32 %v317_v42, %v751_v4  ;;  %v290_v47 = vmul.f32 %v524_v39, %v799_v19  ;;  %v282_v8 = vsel %vm281_vm11, %v522_v20, %v278_v43 }
 0x156   : > { %348 = vst [vmem:[%s809_s23 + $0x30] sm:$0xff] %v340_v40  ;;  %v287_v2 = vsel %vm284_vm12, %v286_v46, %v282_v8  ;;  %vm295_vm13 = vweird.f32 %v524_v39 }
 0x157   : > { %349 = vst [vmem:[%s809_s23 + $0x38] sm:$0xff] %v341_v41  ;;  %v291_v4 = vsub.f32 1.0, %v290_v47  ;;  %v334_v9 = vmul.f32 %v287_v2, %v743_v0  ;;  %v335_v48 = vmul.f32 %v287_v2, %v745_v1  ;;  %vm296_vm15 = vmor %vm294_vm14, %vm295_vm13  ;;  %v301_v0 = vor.u32 1.1754944e-38, %v300_v49 }
 0x158   : > { %346 = vst [vmem:[%s809_s23 + $0x20] sm:$0xff] %v338_v44 }
 0x159   : > { %347 = vst [vmem:[%s809_s23 + $0x28] sm:$0xff] %v339_v45  ;;  %v292_v50 = vmul.f32 %v524_v39, %v291_v4 }
 0x15a   : > { %342 = vst [vmem:[%s809_s23] sm:$0xff] %v334_v9 }
 0x15b   : > { %343 = vst [vmem:[%s809_s23 + $0x8] sm:$0xff] %v335_v48  ;;  %v293_v52 = vadd.f32 %v524_v39, %v292_v50 }
 0x15d   : > { %v297_v1 = vsel %vm296_vm15, %v524_v39, %v293_v52 }
 0x15e   : > { %v302_v53 = vsel %vm299_vm0, %v301_v0, %v297_v1 }
 0x15f   : > { %v336_v54 = vmul.f32 %v302_v53, %v755_v6  ;;  %v337_v55 = vmul.f32 %v302_v53, %v757_v7 }
 0x161   : > { %344 = vst [vmem:[%s809_s23 + $0x10] sm:$0xff] %v336_v54 }
 0x162   : > { %345 = vst [vmem:[%s809_s23 + $0x18] sm:$0xff] %v337_v55 }
 0x163   : > { %582 = shalt.err (!%p579_p4)
}
 0x164   : > { %s625_s29 = smov 256   ;;  %s626_s28 = smov 16  }
 0x165   : > { %461 = dma.vmem_to_hbm [thread:$0]  (%p697_p11), %s364_s8, 1024, %s366_s9, %s351_s10, %s625_s29, %s625_s29, %s626_s28  }
 0x166 PF: > { %s380_s4 = sand.u32 1, %s609_s12   ;;  %p869_p7 = scmp.ge.s32.totalorder %s621_s15, 2 }
 0x167   : > { %s381_s6 = scalar_lea.sflag [#allocation4], %s380_s4 }
 0x168   : > { %p468_p5 = pnand %p869_p7, %p701_p12 }
 0x16a   : > { %p469_p8 = pneg %p468_p5 }
 0x16c   : > { %604 = dma.done.wait (%p469_p8), %s381_s6, 1024  }
 0x16d   : > { %606 = vsyncadd (%p469_p8), %s381_s6, 4294966272  ;;  %p16_p10 = scmp.ge.s32.totalorder %s672_s18, 4   ;;  %s870_s12 = smov %s613_s13 }
 0x16e   : > { %s871_s13 = smov %s617_s14  ;;  %s872_s14 = smov %s684_s21 }
 0x16f   : > { %s873_s15 = smov %s672_s18  ;;  %18 = sbr.rel (!%p16_p10) target bundleno = 5 (0x5), region = 77 }
 0x174   :  { %387 = vsyncpa [#allocation3], 1 }
 0x175   :  { %389 = vsyncpa [#allocation3 + $0x1], 1 }
 0x176   :  { %390 = vsyncpa [#allocation4], 1 }
 0x177   :  { %392 = vsyncpa [#allocation4 + $0x1], 1 }

</bundles_post_ra>
